<compile_context>
chip_gen: v7x
topology: tpu7x:2x2x1
jax: 0.10.0
libtpu: 0.0.40
codegen_flags: <defaults>
</compile_context>

<pallas_src>
import functools

import jax
import jax.numpy as jnp
from jax import lax
from jax.experimental import pallas as pl
from jax.experimental.pallas import tpu as pltpu

N_PATCH = 16            # nn.Unfold(N, padding=0, stride=N//2)
STRIDE = N_PATCH // 2
EPS = 1e-12             # F.normalize default eps


# ----------------------------------------------------------------------------
# Plain-JAX glue (no learnable parameters in this module).
# ----------------------------------------------------------------------------
def _aflow_to_grid(aflow):
    """FullSampler._aflow_to_grid: absolute flow -> normalized [-1,1] grid."""
    B, two, H, W = aflow.shape
    assert two == 2
    g = jnp.transpose(aflow, (0, 2, 3, 1)).astype(jnp.float32)      # (B,H,W,2)
    gx = g[..., 0] * (2.0 / (W - 1)) - 1.0
    gy = g[..., 1] * (2.0 / (H - 1)) - 1.0
    grid = jnp.stack([gx, gy], axis=-1)
    grid = jnp.where(jnp.isnan(grid), 9e9, grid)                    # invalids
    return grid


# TODO(synk): bilinear grid_sample is a data-dependent gather with no clean
# Pallas/TPU equivalent; kept in plain JAX.
def _grid_sample_bilinear_border(img, grid):
    """F.grid_sample(img, grid, mode='bilinear', padding_mode='border'),
    align_corners=False (current PyTorch default)."""
    B, C, H, W = img.shape
    im = img[:, 0]                                                  # (B,H,W)
    gx, gy = grid[..., 0], grid[..., 1]
    x = ((gx + 1.0) * W - 1.0) * 0.5
    y = ((gy + 1.0) * H - 1.0) * 0.5
    x = jnp.clip(x, 0.0, W - 1.0)                                   # border pad
    y = jnp.clip(y, 0.0, H - 1.0)
    x0 = jnp.floor(x)
    y0 = jnp.floor(y)
    wx = x - x0
    wy = y - y0
    x0i = x0.astype(jnp.int32)
    y0i = y0.astype(jnp.int32)
    x1i = jnp.minimum(x0i + 1, W - 1)
    y1i = jnp.minimum(y0i + 1, H - 1)
    b = jnp.arange(B)[:, None, None]
    g00 = im[b, y0i, x0i]
    g01 = im[b, y0i, x1i]
    g10 = im[b, y1i, x0i]
    g11 = im[b, y1i, x1i]
    out = (g00 * (1 - wx) * (1 - wy) + g01 * wx * (1 - wy)
           + g10 * (1 - wx) * wy + g11 * wx * wy)
    return out[:, None]                                             # (B,1,H,W)


def _extract_patches(sal, n=N_PATCH, stride=STRIDE):
    """nn.Unfold(n, padding=0, stride=stride)(sal).transpose(1,2): (B, L, n*n).
    Used only by the pure-JAX reference; the Pallas path fuses the unfold."""
    B, C, H, W = sal.shape
    assert C == 1
    x = sal[:, 0]
    lh = (H - n) // stride + 1
    lw = (W - n) // stride + 1
    rows = (jnp.arange(lh) * stride)[:, None] + jnp.arange(n)[None, :]   # (lh,n)
    cols = (jnp.arange(lw) * stride)[:, None] + jnp.arange(n)[None, :]   # (lw,n)
    p = x[:, rows[:, None, :, None], cols[None, :, None, :]]            # (B,lh,lw,n,n)
    return p.reshape(B, lh * lw, n * n)


# ----------------------------------------------------------------------------
# Pallas kernel: fused unfold + per-patch cosine similarity.
#   grid = (B,)  ["parallel"]; each step streams one (H, W) map pair and writes
#   a lane-dense (lh_pad, lw_pad) block of per-patch cosims (padding = 0).
# ----------------------------------------------------------------------------
def _round_up(x, m):
    return ((x + m - 1) // m) * m


def _window_matrix(size, n, stride, num_pad):
    """(num_pad, size) f32 0/1 matrix: row i (< num valid windows) has ones on
    pixels [i*stride, i*stride + n); padded rows are all zero."""
    num = (size - n) // stride + 1
    idx = jnp.arange(size)[None, :]                      # (1, size)
    start = (jnp.arange(num_pad) * stride)[:, None]      # (num_pad, 1)
    row_valid = (jnp.arange(num_pad) < num)[:, None]
    sel = (idx >= start) & (idx < start + n) & row_valid
    return sel.astype(jnp.float32)


def _cosim_fused_kernel(s1_ref, s2_ref, rsel_ref, csel_ref, out_ref, *, lh, lw):
    s1 = s1_ref[0].astype(jnp.float32)                   # (H, W)
    s2 = s2_ref[0].astype(jnp.float32)
    rsel = rsel_ref[...]                                  # (lh_pad, H) 0/1 row windows
    csel = csel_ref[...]                                  # (W, lw_pad) 0/1 col windows

    def box_sum(x):
        # 16x16 stride-8 window sums as two MXU matmuls (no XLU lane reduce).
        rs = jnp.dot(rsel, x, preferred_element_type=jnp.float32)      # (lh_pad, W)
        return jnp.dot(rs, csel, preferred_element_type=jnp.float32)   # (lh_pad, lw_pad)

    s12 = box_sum(s1 * s2)                                # per-patch <p1, p2>
    n1s = box_sum(s1 * s1)                                # per-patch ||p1||^2
    n2s = box_sum(s2 * s2)                                # per-patch ||p2||^2

    eps2 = jnp.float32(EPS * EPS)                         # sqrt monotone => same eps as F.normalize
    cos = (s12
           * lax.rsqrt(jnp.maximum(n1s, eps2))
           * lax.rsqrt(jnp.maximum(n2s, eps2)))

    # Padded windows are exact zeros by construction (all-zero selector rows /
    # cols); mask anyway so the wrapper-side sum is safe even for NaN inputs.
    lhp, lwp = out_ref.shape
    rid = lax.broadcasted_iota(jnp.int32, (lhp, lwp), 0)
    cid = lax.broadcasted_iota(jnp.int32, (lhp, lwp), 1)
    out_ref[...] = jnp.where((rid < lh) & (cid < lw), cos, 0.0)


def _cosim_from_maps(s1, s2, n=N_PATCH, stride=STRIDE):
    """Mean cosine similarity of overlapping n x n (stride n/2) patches of two
    (B, H, W) maps; the unfold is fused into the Pallas kernel."""
    B, H, W = s1.shape
    lh = (H - n) // stride + 1
    lw = (W - n) // stride + 1
    assert lh > 0 and lw > 0, "image smaller than one patch"
    lh_pad = _round_up(lh, 8)
    lw_pad = _round_up(lw, 128)

    s1 = s1.astype(jnp.float32)
    s2 = s2.astype(jnp.float32)
    rsel = _window_matrix(H, n, stride, lh_pad)           # (lh_pad, H)
    csel = _window_matrix(W, n, stride, lw_pad).T         # (W, lw_pad)

    kernel = functools.partial(_cosim_fused_kernel, lh=lh, lw=lw)
    cost = pl.CostEstimate(
        flops=B * (3 * H * W + 6 * lh_pad * W * (H + lw_pad) + 5 * lh_pad * lw_pad),
        transcendentals=2 * B * lh_pad * lw_pad,
        bytes_accessed=(2 * B * H * W + B * lh_pad * lw_pad
                        + lh_pad * H + W * lw_pad) * 4)

    # TODO(synk): for very large images (full map pair + temporaries nearing
    # the scoped-VMEM limit) add a second grid axis over strips of whole patch
    # rows; unnecessary for typical r2d2 training resolutions.
    cosim = pl.pallas_call(
        kernel,
        out_shape=jax.ShapeDtypeStruct((B * lh_pad, lw_pad), jnp.float32),
        grid=(B,),
        in_specs=[pl.BlockSpec((1, H, W), lambda b: (b, 0, 0)),
                  pl.BlockSpec((1, H, W), lambda b: (b, 0, 0)),
                  pl.BlockSpec((lh_pad, H), lambda b: (0, 0)),
                  pl.BlockSpec((W, lw_pad), lambda b: (0, 0))],
        out_specs=pl.BlockSpec((lh_pad, lw_pad), lambda b: (b, 0)),
        compiler_params=pltpu.CompilerParams(
            dimension_semantics=("parallel",),
            vmem_limit_bytes=48 << 20),
        cost_estimate=cost,
    )(s1, s2, rsel, csel)

    return jnp.sum(cosim) / jnp.float32(B * lh * lw)


def cosim_loss(repeatability, aflow, n=N_PATCH):
    """Equivalent of CosimLoss(N=n).forward(repeatability, aflow)."""
    sali1, sali2 = repeatability
    grid = _aflow_to_grid(aflow)
    sali2w = _grid_sample_bilinear_border(sali2, grid)
    mean_cosim = _cosim_from_maps(sali1[:, 0], sali2w[:, 0], n, n // 2)
    return 1.0 - mean_cosim


# Pure-JAX reference for verification (explicit unfold + F.normalize).
def cosim_loss_ref(repeatability, aflow, n=N_PATCH):
    sali1, sali2 = repeatability
    grid = _aflow_to_grid(aflow)
    sali2w = _grid_sample_bilinear_border(sali2, grid)
    p1 = _extract_patches(sali1, n, n // 2)
    p2 = _extract_patches(sali2w, n, n // 2)

    def normalize(p):
        nrm = jnp.sqrt(jnp.sum(p * p, axis=2, keepdims=True))
        return p / jnp.maximum(nrm, EPS)

    cosim = jnp.sum(normalize(p1) * normalize(p2), axis=2)
    return 1.0 - jnp.mean(cosim)


if __name__ == "__main__":
    key = jax.random.PRNGKey(0)
    B, H, W = 2, 32, 32                      # 3x3 = 9 patches of 16x16 per image
    k1, k2, k3 = jax.random.split(key, 3)

    sali1 = jax.nn.sigmoid(jax.random.normal(k1, (B, 1, H, W), jnp.float32))
    sali2 = jax.nn.sigmoid(jax.random.normal(k2, (B, 1, H, W), jnp.float32))

    # Absolute flow ~ identity + noise (channel 0 = x coords, channel 1 = y coords).
    yy, xx = jnp.meshgrid(jnp.arange(H, dtype=jnp.float32),
                          jnp.arange(W, dtype=jnp.float32), indexing="ij")
    aflow = (jnp.stack([xx, yy])[None].repeat(B, axis=0)
             + 1.5 * jax.random.normal(k3, (B, 2, H, W), jnp.float32))

    loss = cosim_loss((sali1, sali2), aflow)
    loss = jax.block_until_ready(loss)

    ref = cosim_loss_ref((sali1, sali2), aflow)
    assert jnp.allclose(loss, ref, atol=1e-5, rtol=1e-5), (loss, ref)
    print("KERNEL_OK")
</pallas_src>

<mosaic_0001>
module attributes {stable_mosaic.version = 11 : i64} {
  func.func @_cosim_fused_kernel(%arg0: i32, %arg1: memref<1x32x32xf32, #tpu.memory_space<vmem>>, %arg2: memref<1x32x32xf32, #tpu.memory_space<vmem>>, %arg3: memref<8x32xf32, #tpu.memory_space<vmem>>, %arg4: memref<32x128xf32, #tpu.memory_space<vmem>>, %arg5: memref<8x128xf32, #tpu.memory_space<vmem>>) attributes {dimension_semantics = [#tpu.dimension_semantics<parallel>], iteration_bounds = array<i64: 2>, scalar_prefetch = 0 : i64, scratch_operands = 0 : i64, tpu.core_type = #tpu.core_type<tc>, window_params = [{transform_indices = @transform_0, window_bounds = array<i64: 1, 32, 32>}, {transform_indices = @transform_1, window_bounds = array<i64: 1, 32, 32>}, {pipeline_mode = #tpu.pipeline_mode<synchronous>, transform_indices = @transform_2, window_bounds = array<i64: 8, 32>}, {pipeline_mode = #tpu.pipeline_mode<synchronous>, transform_indices = @transform_3, window_bounds = array<i64: 32, 128>}, {transform_indices = @transform_4, window_bounds = array<i64: 8, 128>}]} {
    %c0 = arith.constant 0 : index
    %c0_0 = arith.constant 0 : index
    %c0_1 = arith.constant 0 : index
    %0 = vector.load %arg1[%c0, %c0_0, %c0_1] : memref<1x32x32xf32, #tpu.memory_space<vmem>>, vector<1x32x32xf32>
    %1 = vector.shape_cast %0 : vector<1x32x32xf32> to vector<32x32xf32>
    %c0_2 = arith.constant 0 : index
    %c0_3 = arith.constant 0 : index
    %c0_4 = arith.constant 0 : index
    %2 = vector.load %arg2[%c0_2, %c0_3, %c0_4] : memref<1x32x32xf32, #tpu.memory_space<vmem>>, vector<1x32x32xf32>
    %3 = vector.shape_cast %2 : vector<1x32x32xf32> to vector<32x32xf32>
    %c0_5 = arith.constant 0 : index
    %c0_6 = arith.constant 0 : index
    %4 = vector.load %arg3[%c0_5, %c0_6] : memref<8x32xf32, #tpu.memory_space<vmem>>, vector<8x32xf32>
    %c0_7 = arith.constant 0 : index
    %c0_8 = arith.constant 0 : index
    %5 = vector.load %arg4[%c0_7, %c0_8] : memref<32x128xf32, #tpu.memory_space<vmem>>, vector<32x128xf32>
    %6 = arith.mulf %1, %3 : vector<32x32xf32>
    %cst = arith.constant dense<0.000000e+00> : vector<8x32xf32>
    %7 = tpu.matmul %4, %6, %cst {dimension_numbers = #tpu.dot_dimension_numbers<[1], [0], [0], [1], [0, 0, 1, 1], [], []>} : vector<8x32xf32>, vector<32x32xf32>, vector<8x32xf32> -> vector<8x32xf32>
    %cst_9 = arith.constant dense<0.000000e+00> : vector<8x128xf32>
    %8 = tpu.matmul %7, %5, %cst_9 {dimension_numbers = #tpu.dot_dimension_numbers<[1], [0], [0], [1], [0, 0, 1, 1], [], []>} : vector<8x32xf32>, vector<32x128xf32>, vector<8x128xf32> -> vector<8x128xf32>
    %9 = arith.mulf %1, %1 : vector<32x32xf32>
    %cst_10 = arith.constant dense<0.000000e+00> : vector<8x32xf32>
    %10 = tpu.matmul %4, %9, %cst_10 {dimension_numbers = #tpu.dot_dimension_numbers<[1], [0], [0], [1], [0, 0, 1, 1], [], []>} : vector<8x32xf32>, vector<32x32xf32>, vector<8x32xf32> -> vector<8x32xf32>
    %cst_11 = arith.constant dense<0.000000e+00> : vector<8x128xf32>
    %11 = tpu.matmul %10, %5, %cst_11 {dimension_numbers = #tpu.dot_dimension_numbers<[1], [0], [0], [1], [0, 0, 1, 1], [], []>} : vector<8x32xf32>, vector<32x128xf32>, vector<8x128xf32> -> vector<8x128xf32>
    %12 = arith.mulf %3, %3 : vector<32x32xf32>
    %cst_12 = arith.constant dense<0.000000e+00> : vector<8x32xf32>
    %13 = tpu.matmul %4, %12, %cst_12 {dimension_numbers = #tpu.dot_dimension_numbers<[1], [0], [0], [1], [0, 0, 1, 1], [], []>} : vector<8x32xf32>, vector<32x32xf32>, vector<8x32xf32> -> vector<8x32xf32>
    %cst_13 = arith.constant dense<0.000000e+00> : vector<8x128xf32>
    %14 = tpu.matmul %13, %5, %cst_13 {dimension_numbers = #tpu.dot_dimension_numbers<[1], [0], [0], [1], [0, 0, 1, 1], [], []>} : vector<8x32xf32>, vector<32x128xf32>, vector<8x128xf32> -> vector<8x128xf32>
    %cst_14 = arith.constant 1.000000e-24 : f32
    %15 = vector.broadcast %cst_14 : f32 to vector<8x128xf32>
    %16 = arith.maximumf %11, %15 : vector<8x128xf32>
    %17 = math.rsqrt %16 : vector<8x128xf32>
    %18 = arith.mulf %8, %17 : vector<8x128xf32>
    %cst_15 = arith.constant 1.000000e-24 : f32
    %19 = vector.broadcast %cst_15 : f32 to vector<8x128xf32>
    %20 = arith.maximumf %14, %19 : vector<8x128xf32>
    %21 = math.rsqrt %20 : vector<8x128xf32>
    %22 = arith.mulf %18, %21 : vector<8x128xf32>
    %23 = tpu.iota {dimensions = array<i32: 0>} : vector<8x128xi32>
    %24 = tpu.iota {dimensions = array<i32: 1>} : vector<8x128xi32>
    %c3_i32 = arith.constant 3 : i32
    %25 = vector.broadcast %c3_i32 : i32 to vector<8x128xi32>
    %26 = arith.cmpi slt, %23, %25 : vector<8x128xi32>
    %c3_i32_16 = arith.constant 3 : i32
    %27 = vector.broadcast %c3_i32_16 : i32 to vector<8x128xi32>
    %28 = arith.cmpi slt, %24, %27 : vector<8x128xi32>
    %29 = arith.andi %26, %28 : vector<8x128xi1>
    %cst_17 = arith.constant 0.000000e+00 : f32
    %30 = vector.broadcast %cst_17 : f32 to vector<8x128xf32>
    %31 = arith.select %29, %22, %30 : vector<8x128xi1>, vector<8x128xf32>
    %c0_18 = arith.constant 0 : index
    %c0_19 = arith.constant 0 : index
    %32 = vector.load %arg5[%c0_18, %c0_19] : memref<8x128xf32, #tpu.memory_space<vmem>>, vector<8x128xf32>
    tpu.vector_store %arg5[%c0_18, %c0_19], %31 {strides = array<i32>} : memref<8x128xf32, #tpu.memory_space<vmem>>, vector<8x128xf32>,
    return
  }
  func.func @transform_0(%arg0: i32) -> (i32, i32, i32) {
    %c0_i32 = arith.constant 0 : i32
    %c0_i32_0 = arith.constant 0 : i32
    %c0_i32_1 = arith.constant 0 : i32
    return %arg0, %c0_i32, %c0_i32_0 : i32, i32, i32
  }
  func.func @transform_1(%arg0: i32) -> (i32, i32, i32) {
    %c0_i32 = arith.constant 0 : i32
    %c0_i32_0 = arith.constant 0 : i32
    %c0_i32_1 = arith.constant 0 : i32
    return %arg0, %c0_i32, %c0_i32_0 : i32, i32, i32
  }
  func.func @transform_2(%arg0: i32) -> (i32, i32) {
    %c0_i32 = arith.constant 0 : i32
    %c0_i32_0 = arith.constant 0 : i32
    %c0_i32_1 = arith.constant 0 : i32
    return %c0_i32, %c0_i32_0 : i32, i32
  }
  func.func @transform_3(%arg0: i32) -> (i32, i32) {
    %c0_i32 = arith.constant 0 : i32
    %c0_i32_0 = arith.constant 0 : i32
    %c0_i32_1 = arith.constant 0 : i32
    return %c0_i32, %c0_i32_0 : i32, i32
  }
  func.func @transform_4(%arg0: i32) -> (i32, i32) {
    %c0_i32 = arith.constant 0 : i32
    %c0_i32_0 = arith.constant 0 : i32
    return %arg0, %c0_i32 : i32, i32
  }
}

</mosaic_0001>

<bundles_post_ra>
// kernel: tpu_custom_call.1
= control target key start
LH: loop header
LB: loop body
LE: loop exit
PB: predicated region body
PF: predicated region fallthrough
CT: control target
= control target key end

     0   :  { %s1675_s0 = inlined_call_operand.hbm [shape: f32[2,32,32], index: 0, kind: input, shape index: {}]   ;;  %s1676_s1 = inlined_call_operand.hbm [shape: f32[2,32,32], index: 1, kind: input, shape index: {}]   ;;  %s1677_s2 = inlined_call_operand.hbm [shape: f32[8,32], index: 2, kind: input, shape index: {}]   ;;  %s1678_s3 = inlined_call_operand.hbm [shape: f32[32,128], index: 3, kind: input, shape index: {}]   ;;  %s1679_s4 = inlined_call_operand.hbm [shape: f32[16,128], index: 4, kind: output, shape index: {}]  }
   0x1   :  { %1686 = sst [smem:[#allocation16_spill]] %s1675_s0 }
   0x2   :  { %9 = vsyncpa [#allocation3], 0 }
   0x3   :  { %11 = vsyncpa [#allocation3 + $0x1], 0 }
   0x4   :  { %12 = vsyncpa [#allocation6], 0 }
   0x5   :  { %14 = vsyncpa [#allocation6 + $0x1], 0 }
   0x6   :  { %15 = vsyncpa [#allocation9], 0 }
   0x7   :  { %16 = vsyncpa [#allocation4], 0 }
   0x8   :  { %18 = vsyncpa [#allocation4 + $0x1], 0  ;;  %s1355_s15 = smov 0   ;;  %s1357_s16 = smov 0  }
   0x9   :  { %s1359_s17 = smov 0   ;;  %s1361_s18 = smov 0  }
   0xa LB: > { %s1376_s19 = sadd.s32 4294967295, %s1318_s18   ;;  %s882_s20 = sadd.s32 4294967294, %s1318_s18   ;;  %s1318_s18 = sphi %s1361_s18, %s1710_s18   ;;  %s1314_s17 = sphi %s1359_s17, %s1709_s17   ;;  %s1310_s16 = sphi %s1357_s16, %s1708_s16   ;;  %s1306_s15 = sphi %s1355_s15, %s1707_s15  }
   0xb   : > { %s1380_s21 = sadd.s32 1, %s1318_s18   ;;  %s31_s22 = sadd.s32 1, %s1314_s17 }
   0xc   : > { %s28_s23 = ssub.s32 %s1318_s18, %s1380_s21  ;;  %p38_p0 = scmp.ne.s32.totalorder %s1314_s17, %s1310_s16 }
   0xd   : > { %p29_p1 = scmp.eq.s32.totalorder %s28_s23, 0  ;;  %p39_p2 = scmp.eq.s32.totalorder %s1318_s18, 0 }
   0xe   : > { %p44_p3 = scmp.ne.s32.totalorder %s1310_s16, %s1306_s15  ;;  %p1680_p4 = scmp.eq.s32.totalorder %s1376_s19, 0 }
   0xf   : > { %s1392_s24 = scalar_select %p29_p1, %s1314_s17, %s31_s22  }
  0x10   : > { %p1394_p5 = por %p39_p2, %p38_p0  ;;  %p1400_p6 = por %p1680_p4, %p44_p3 }
  0x11   : > { %p136_p7 = scmp.eq.s32.totalorder %s1376_s19, 1  ;;  %p142_p8 = scmp.eq.s32.totalorder %s882_s20, 1 }
  0x12   : > { %s1688_s26 = scalar_select %p1400_p6, 1, 0 }
  0x13   : > { %p883_p9 = scmp.ge.s32.totalorder %s1318_s18, 1  ;;  %p149_p10 = scmp.lt.s32.totalorder %s1318_s18, 3 }
  0x14   : > { %p1407_p11 = por %p136_p7, %p38_p0  ;;  %p1411_p12 = por %p142_p8, %p44_p3 }
  0x15   : > { %p1415_p13 = pnand %p883_p9, %p149_p10  ;;  %s1320_s30 = smov [#allocation7]  }
  0x16   : > { %s1689_s27 = scalar_select %p1407_p11, 1, 0 }
  0x17   : > { %s1690_s28 = scalar_select %p1411_p12, 1, 0 }
  0x18   : > { %s1691_s29 = scalar_select %p1415_p13, 1, 0 }
  0x19   : > { %p1057_p2 = pneg %p1415_p13  ;;  %s162_s5 = sshll.u32 %s1320_s30, 4  ;;  %s163_s5 = int_to_ptr.vmem [resolvable:$true] %s162_s5 }
  0x1a   : > { %p1077_p4 = scmp.lt.s32.totalorder %s1318_s18, 2  ;;  %p1692_p0 = scmp.eq.s32.totalorder %s1376_s19, 0 }
  0x1b   : > { %s1321_s8 = smov [#allocation8]   ;;  %s1124_s12 = scalar_lea.hbm %s1677_s2, 128 }
  0x1c   : > { %p1425_p7 = pnand %p1057_p2, %p1692_p0  ;;  %p1431_p3 = pnand %p1077_p4, %p1394_p5 }
  0x1d   : > { %s172_s9 = sshll.u32 %s1321_s8, 4  ;;  %p1125_p8 = scmp.ne.s32.totalorder %s1677_s2, %s1124_s12  ;;  %s1435_s9 = int_to_ptr.vmem [resolvable:$true] %s172_s9 }
  0x1e   : > { %s1694_s7 = scalar_select %p1431_p3, 1, 0 }
  0x1f   : > { %p1126_p9 = pneg %p1425_p7  ;;  %p1131_p10 = scmp.lt.u32.totalorder %s1124_s12, %s1677_s2 }
  0x21   : > { %p1127_p4 = pnand %p1126_p9, %p1125_p8 }
  0x23   : > { %p1128_p5 = pneg %p1127_p4 }
  0x25   : > { %p1133_p2 = pnand %p1131_p10, %p1128_p5 }
  0x27   : > { %1136 = shalt.err (!%p1133_p2)
}
  0x28   : > { %s1137_s23 = scalar_lea.vmem %s163_s5, 128  ;;  %p1145_p11 = scmp.lt.s32.totalorder %s163_s5, %s163_s5 }
  0x29   : > { %p1138_p0 = scmp.ne.s32.totalorder %s163_s5, %s1137_s23  ;;  %p1146_p6 = scmp.lt.s32.totalorder %s1137_s23, %s1137_s23 }
  0x2b   : > { %p1140_p1 = pnand %p1138_p0, %p1126_p9  ;;  %p1147_p13 = por %p1146_p6, %p1145_p11 }
  0x2d   : > { %p1141_p12 = pneg %p1140_p1 }
  0x2f   : > { %p1148_p3 = pnand %p1147_p13, %p1141_p12 }
  0x31   : > { %1151 = shalt.err (!%p1148_p3)
}
  0x32   : > { %1060 = dma.hbm_to_vmem [thread:$0]  (!%p1425_p7), %s1677_s2, 128, %s163_s5, [#allocation6]  }
  0x33   : > { %s186_s8 = sand.u32 1, %s1314_s17   ;;  %s1152_s12 = scalar_lea.hbm %s1678_s3, 512 }
  0x34   : > { %p1153_p1 = scmp.ne.s32.totalorder %s1678_s3, %s1152_s12  ;;  %p1159_p12 = scmp.lt.u32.totalorder %s1152_s12, %s1678_s3 }
  0x36   : > { %p1155_p6 = pnand %p1153_p1, %p1126_p9 }
  0x38   : > { %p1156_p11 = pneg %p1155_p6 }
  0x3a   : > { %p1161_p13 = pnand %p1159_p12, %p1156_p11 }
  0x3c   : > { %1164 = shalt.err (!%p1161_p13)
}
  0x3d   : > { %s1165_s5 = scalar_lea.vmem %s1435_s9, 512  ;;  %p1173_p5 = scmp.lt.s32.totalorder %s1435_s9, %s1435_s9 }
  0x3e   : > { %p1166_p3 = scmp.ne.s32.totalorder %s1435_s9, %s1165_s5  ;;  %p1174_p10 = scmp.lt.s32.totalorder %s1165_s5, %s1165_s5 }
  0x40   : > { %p1168_p8 = pnand %p1166_p3, %p1126_p9  ;;  %p1175_p2 = por %p1174_p10, %p1173_p5 }
  0x42   : > { %p1169_p4 = pneg %p1168_p8 }
  0x44   : > { %p1176_p0 = pnand %p1175_p2, %p1169_p4 }
  0x46   : > { %1179 = shalt.err (!%p1176_p0)
}
  0x47   : > { %s1322_s23 = smov 128   ;;  %s1323_s25 = smov 8  }
  0x48   : > { %1063 = dma.hbm_to_vmem [thread:$0]  (!%p1425_p7), %s1678_s3, 512, %s1435_s9, [#allocation9], %s1322_s23, %s1322_s23, %s1323_s25  }
  0x49   : > { %s1488_s11 = sshll.u32 %s186_s8, 5  ;;  %s1685_s12 = sshll.u32 %s1318_s18, 9 }
  0x4a   : > { %s1695_s0 = sld [smem:[#allocation16_spill]]  ;;  %s190_s6 = scalar_lea.vmem [#allocation2], %s1488_s11 }
  0x4b   : > { %s197_s22 = sshll.u32 %s190_s6, 4  ;;  %s1501_s5 = scalar_lea.sflag [#allocation3], %s186_s8  ;;  %s1499_s22 = int_to_ptr.vmem [resolvable:$true] %s197_s22 }
  0x4c   : > { %p1696_p9 = scmp.ne.s32.totalorder %s1694_s7, 0 }
  0x4e   : > { %p1182_p1 = pneg %p1696_p9 }
  0x50   : > { %s1496_s20 = scalar_lea.hbm %s1695_s0, %s1685_s12  ;;  %s1185_s13 = scalar_lea.hbm %s1695_s0, 1024 }
  0x51   : > { %s1180_s9 = scalar_lea.hbm %s1496_s20, 512  ;;  %p1186_p12 = scmp.lt.u32.totalorder %s1496_s20, %s1695_s0 }
  0x52   : > { %p1181_p7 = scmp.ne.s32.totalorder %s1496_s20, %s1180_s9  ;;  %p1187_p13 = scmp.lt.u32.totalorder %s1185_s13, %s1180_s9 }
  0x53   : > { %p1189_p8 = scmp.lt.u32.totalorder %s1180_s9, %s1496_s20 }
  0x54   : > { %p1183_p6 = pnand %p1182_p1, %p1181_p7  ;;  %p1188_p3 = por %p1187_p13, %p1186_p12 }
  0x56   : > { %p1184_p11 = pneg %p1183_p6  ;;  %p1190_p4 = por %p1189_p8, %p1188_p3 }
  0x58   : > { %p1191_p5 = pnand %p1190_p4, %p1184_p11 }
  0x5a   : > { %1194 = shalt.err (!%p1191_p5)
}
  0x5b   : > { %s1195_s8 = scalar_lea.vmem %s1499_s22, 512  ;;  %s1324_s6 = smov [#allocation2]  }
  0x5c   : > { %p1196_p10 = scmp.ne.s32.totalorder %s1499_s22, %s1195_s8  ;;  %s1200_s30 = sshll.u32 %s1324_s6, 4  ;;  %s1201_s30 = int_to_ptr.vmem [resolvable:$false] %s1200_s30 }
  0x5d   : > { %s1202_s12 = scalar_lea.vmem %s1201_s30, 1024  ;;  %p1203_p7 = scmp.lt.s32.totalorder %s1499_s22, %s1201_s30 }
  0x5e   : > { %p1198_p2 = pnand %p1196_p10, %p1182_p1  ;;  %p1204_p6 = scmp.lt.s32.totalorder %s1202_s12, %s1195_s8 }
  0x60   : > { %p1199_p0 = pneg %p1198_p2  ;;  %p1205_p12 = por %p1204_p6, %p1203_p7 }
  0x62   : > { %p1206_p13 = pnand %p1205_p12, %p1199_p0 }
  0x64   : > { %1209 = shalt.err (!%p1206_p13)
}
  0x65   : > { %1067 = dma.hbm_to_vmem [thread:$0]  (!%p1696_p9), %s1496_s20, 512, %s1499_s22, %s1501_s5, %s1322_s23, %s1322_s23, %s1323_s25  }
  0x66   : > { %s1697_s9 = sshll.u32 %s1318_s18, 9  ;;  %s211_s8 = scalar_lea.vmem [#allocation5], %s1488_s11 }
  0x67   : > { %s1537_s14 = scalar_lea.hbm %s1676_s1, %s1697_s9  ;;  %s218_s6 = sshll.u32 %s211_s8, 4  ;;  %s1540_s6 = int_to_ptr.vmem [resolvable:$true] %s218_s6 }
  0x68   : > { %s207_s30 = sand.u32 1, %s1318_s18   ;;  %s1210_s0 = scalar_lea.hbm %s1537_s14, 512 }
  0x69   : > { %s1543_s12 = scalar_lea.sflag [#allocation6], %s207_s30  ;;  %p1211_p11 = scmp.ne.s32.totalorder %s1537_s14, %s1210_s0 }
  0x6a   : > { %s1215_s5 = scalar_lea.hbm %s1676_s1, 1024  ;;  %p1216_p4 = scmp.lt.u32.totalorder %s1537_s14, %s1676_s1 }
  0x6b   : > { %p1213_p3 = pnand %p1211_p11, %p1182_p1  ;;  %p1217_p5 = scmp.lt.u32.totalorder %s1215_s5, %s1210_s0 }
  0x6c   : > { %p1219_p2 = scmp.lt.u32.totalorder %s1210_s0, %s1537_s14 }
  0x6d   : > { %p1214_p8 = pneg %p1213_p3  ;;  %p1218_p10 = por %p1217_p5, %p1216_p4 }
  0x6f   : > { %p1220_p0 = por %p1219_p2, %p1218_p10 }
  0x71   : > { %p1221_p7 = pnand %p1220_p0, %p1214_p8 }
  0x73   : > { %1224 = shalt.err (!%p1221_p7)
}
  0x74   : > { %s1225_s11 = scalar_lea.vmem %s1540_s6, 512  ;;  %s1325_s13 = smov [#allocation5]  }
  0x75   : > { %p1226_p6 = scmp.ne.s32.totalorder %s1540_s6, %s1225_s11  ;;  %s1230_s8 = sshll.u32 %s1325_s13, 4  ;;  %s1231_s8 = int_to_ptr.vmem [resolvable:$false] %s1230_s8 }
  0x76   : > { %s1232_s30 = scalar_lea.vmem %s1231_s8, 1024  ;;  %p1233_p11 = scmp.lt.s32.totalorder %s1540_s6, %s1231_s8 }
  0x77   : > { %p1228_p12 = pnand %p1226_p6, %p1182_p1  ;;  %p1234_p3 = scmp.lt.s32.totalorder %s1232_s30, %s1225_s11 }
  0x79   : > { %p1229_p13 = pneg %p1228_p12  ;;  %p1235_p4 = por %p1234_p3, %p1233_p11 }
  0x7b   : > { %p1236_p5 = pnand %p1235_p4, %p1229_p13 }
  0x7d   : > { %1239 = shalt.err (!%p1236_p5)
}
  0x7e   : > { %1070 = dma.hbm_to_vmem [thread:$0]  (!%p1696_p9), %s1537_s14, 512, %s1540_s6, %s1543_s12, %s1322_s23, %s1322_s23, %s1323_s25  }
  0x7f   : > { %p1698_p1 = scmp.ne.s32.totalorder %s1691_s29, 0 }
  0x80   : > { %s1575_s0 = sand.u32 (!%p1698_p1), 1, %s1310_s16   ;;  %p1699_p8 = scmp.ne.s32.totalorder (!%p1698_p1), %s1688_s26, 0 }
  0x81   : > { %230 = sbr.rel (%p1698_p1) target bundleno = 629 (0x275), region = 36  ;;  %s894_s20 = sshll.u32 (!%p1698_p1), %s1575_s0, 5 }
  0x82   : > { %s233_s22 = scalar_lea.sflag (!%p1698_p1), [#allocation3], %s1575_s0  ;;  %s236_s5 = scalar_lea.vmem (!%p1698_p1), [#allocation2], %s894_s20 }
  0x88   : > { %1285 = dma.done.wait (%p1699_p8), %s233_s22, 512  }
  0x89   : > { %1287 = vsyncadd (%p1699_p8), %s233_s22, 4294966784  ;;  %s241_s7 = sand.u32 1, %s1376_s19   ;;  %s245_s29 = scalar_lea.vmem [#allocation5], %s894_s20 }
  0x8a   : > { %s242_s23 = scalar_lea.sflag [#allocation6], %s241_s7 }
  0x8b   : > { %1289 = dma.done.wait (%p1699_p8), %s242_s23, 512  }
  0x8c   : > { %1291 = vsyncadd (%p1699_p8), %s242_s23, 4294966784  ;;  %p1700_p9 = scmp.eq.s32.totalorder %s1376_s19, 0 }
  0x8e   : > { %1293 = dma.done.wait (%p1700_p9), [#allocation6], 128   ;;  %p1701_p10 = pmov %p1700_p9 }
  0x8f   : > { %p1702_p2 = pmov %p1700_p9 }
  0x90   : > { %1295 = vsyncadd (%p1701_p10), [#allocation6], 4294967168 }
  0x91   : > { %1297 = dma.done.wait (%p1702_p2), [#allocation9], 512   ;;  %p1703_p0 = pmov %p1702_p2 }
  0x92   : > { %v1326_v0 = vmov 0.0|0.0   ;;  %vm1327_vm0 = vmmov 0   ;;  %v1328_v1 = vmov 0.0   ;;  %v283_v2 = vld [vmem:[%s236_s5] sm:$0xff]  ;;  %v284_v3 = vld [vmem:[%s236_s5 + $0x8] sm:$0xff]  ;;  %v285_v7 = vld [vmem:[%s236_s5 + $0x10] sm:$0xff]  ;;  %v747_v49 = vlaneseq }
  0x93   : > { %1299 = vsyncadd (%p1703_p0), [#allocation9], 4294966784  ;;  %1007 = vmatprep.subr.bf16.mxu0 %v1326_v0  ;;  %949 = vmatprep.mubr.msk.f32.mxu0 %vm1327_vm0, %v1328_v1  ;;  %v287_v4 = vld [vmem:[%s245_s29] sm:$0xff]  ;;  %v288_v5 = vld [vmem:[%s245_s29 + $0x8] sm:$0xff]  ;;  %v447_v20 = vmul.f32 %v283_v2, %v283_v2  ;;  %v448_v21 = vmul.f32 %v284_v3, %v284_v3  ;;  %v449_v24 = vmul.f32 %v285_v7, %v285_v7  ;;  %vm300_vm1 = vcmask 261120   ;;  %s898_s26 = sshll.u32 %s1575_s0, 3 }
  0x94   : > { %1013 = vmatprep.subr.bf16.mxu1 %v1326_v0  ;;  %960 = vmatprep.mubr.msk.f32.mxu1 %vm1327_vm0, %v1328_v1  ;;  %v296_v6 = vmul.f32 %v287_v4, %v283_v2  ;;  %v286_v8 = vld [vmem:[%s236_s5 + $0x18] sm:$0xff]  ;;  %v297_v9 = vmul.f32 %v288_v5, %v284_v3  ;;  %v289_v10 = vld [vmem:[%s245_s29 + $0x10] sm:$0xff]  ;;  %v292_v14 = vld [vmem:[#allocation8] sm:$0xff]  ;;  %v594_v28 = vmul.f32 %v287_v4, %v287_v4  ;;  %v748_v52 = vshrl.u32 %v747_v49, 7  ;;  %s906_s25 = sshll.u32 %s1376_s19, 7  ;;  %s282_s14 = scalar_lea.vmem [#allocation10], %s898_s26 }
  0x95   : > { %v290_v11 = vld [vmem:[%s245_s29 + $0x18] sm:$0xff]  ;;  %v298_v12 = vmul.f32 %v289_v10, %v285_v7  ;;  %v293_v15 = vld [vmem:[#allocation8 + $0x8] sm:$0xff]  ;;  %v295_v18 = vld [vmem:[#allocation8 + $0x18] sm:$0xff]  ;;  %v450_v25 = vmul.f32 %v286_v8, %v286_v8  ;;  %v1020_v27 = vpack.c.bf16 %v448_v21, %v447_v20  ;;  %v595_v29 = vmul.f32 %v288_v5, %v288_v5  ;;  %s770_s6 = sshll.u32 %s282_s14, 4  ;;  %s1631_s10 = scalar_lea.hbm %s1679_s4, %s906_s25  ;;  %s1633_s6 = int_to_ptr.vmem [resolvable:$true] %s770_s6 }
  0x96   : > { %v299_v13 = vmul.f32 %v290_v11, %v286_v8  ;;  %v1008_v16 = vpack.c.bf16 %v297_v9, %v296_v6  ;;  %v294_v17 = vld [vmem:[#allocation8 + $0x10] sm:$0xff]  ;;  %v1014_v19 = vpack.c.bf16 %v293_v15, %v292_v14  ;;  %v291_v26 = vld [vmem:[#allocation7] sm:$0xff]  ;;  %v596_v31 = vmul.f32 %v289_v10, %v289_v10  ;;  %s757_s11 = scalar_lea.sflag [#allocation4], %s1575_s0  ;;  %s1240_s13 = scalar_lea.vmem %s1633_s6, 128 }
  0x97   : > { %v1017_v23 = vpack.c.bf16 %v295_v18, %v294_v17  ;;  %v1023_v30 = vpack.c.bf16 %v450_v25, %v449_v24  ;;  %v597_v32 = vmul.f32 %v290_v11, %v290_v11  ;;  %v1032_v33 = vpack.c.bf16 %v595_v29, %v594_v28  ;;  %p1241_p7 = scmp.ne.s32.totalorder %s1633_s6, %s1240_s13  ;;  %p1704_p6 = scmp.ne.s32.totalorder %s1689_s27, 0 }
  0x98   : > { %1009 = vmatpush3.bf16.msra.mxu0 %v1008_v16  ;;  %v1011_v22 = vpack.c.bf16 %v299_v13, %v298_v12  ;;  %1015 = vmatpush3.bf16.msra.mxu1 %v1014_v19  ;;  %v750_v53 = vand.u32 127, %v747_v49  ;;  %vm751_vm2 = vcmp.lt.s32.totalorder %v748_v52, 3  ;;  %s1329_s19 = smov [#allocation10]  }
  0x99   : > { %1010 = vmatprep.subr.bf16.mxu0 %v1326_v0  ;;  %1016 = vmatprep.subr.bf16.mxu1 %v1326_v0  ;;  %v1035_v34 = vpack.c.bf16 %v597_v32, %v596_v31  ;;  %p1242_p12 = pnand %p1241_p7, %p1704_p6  ;;  %s1244_s8 = sshll.u32 %s1329_s19, 4  ;;  %s1245_s8 = int_to_ptr.vmem [resolvable:$false] %s1244_s8 }
  0x9a   : > { %vm752_vm3 = vcmp.lt.s32.totalorder %v750_v53, 3  ;;  %s1246_s30 = scalar_lea.vmem %s1245_s8, 256  ;;  %p1247_p11 = scmp.lt.s32.totalorder %s1633_s6, %s1245_s8 }
  0x9b   : > { %vm753_vm4 = vmand %vm751_vm2, %vm752_vm3  ;;  %p1243_p13 = pneg %p1242_p12  ;;  %p1248_p3 = scmp.lt.s32.totalorder %s1246_s30, %s1240_s13 }
  0x9c   : > { %1012 = vmatpush3.bf16.msra.mxu0 %v1011_v22  ;;  %1018 = vmatpush3.bf16.msra.mxu1 %v1017_v23 }
  0x9d   : > { %1019 = vmatprep.subr.bf16.mxu0 %v1326_v0  ;;  %1025 = vmatprep.subr.bf16.mxu1 %v1326_v0  ;;  %p1249_p4 = por %p1248_p3, %p1247_p11 }
  0x9f   : > { %950 = vmatmul.mubr.msk.f32.vlgmr.msra.gmra.mrb[0].mxu0 %vm300_vm1, %v291_v26  ;;  %p1250_p5 = pnand %p1249_p4, %p1243_p13 }
  0xa0   : > { %1021 = vmatpush3.bf16.msra.mxu0 %v1020_v27  ;;  %971 = vmatprep.mubr.msk.f32.mxu0 %vm1327_vm0, %v1328_v1 }
  0xa1   : > { %1022 = vmatprep.subr.bf16.mxu0 %v1326_v0 }
  0xa4   : > { %1024 = vmatpush3.bf16.msra.mxu0 %v1023_v30 }
  0xa5   : > { %1031 = vmatprep.subr.bf16.mxu0 %v1326_v0 }
  0xa7   : > { %972 = vmatmul.mubr.msk.f32.vlgmr.msra.gmra.mrb[2].mxu0 %vm300_vm1, %v291_v26 }
  0xa8   : > { %1033 = vmatpush3.bf16.msra.mxu0 %v1032_v33  ;;  %993 = vmatprep.mubr.msk.f32.mxu0 %vm1327_vm0, %v1328_v1 }
  0xa9   : > { %1034 = vmatprep.subr.bf16.mxu0 %v1326_v0 }
  0xac   : > { %1036 = vmatpush3.bf16.msra.mxu0 %v1035_v34 }
  0xaf   : > { %994 = vmatmul.mubr.msk.f32.vlgmr.msra.gmra.mrb[4].mxu0 %vm300_vm1, %v291_v26 }
 0x172   : > { %v370_v35 = vpop.f32.mrb[0].mxu0 }
 0x173   : > { %v951_v36 = vpop.f32.mrb[1].mxu0  ;;  %961 = vmatmul.mubr.msk.f32.vlgmr.msra.gmra.mrb[0].mxu1 %vm300_vm1, %v370_v35 }
 0x174   : > { %1027 = vmatpush3.bf16.msra.mxu1 %v1014_v19  ;;  %982 = vmatprep.mubr.msk.f32.mxu1 %vm1327_vm0, %v1328_v1 }
 0x175   : > { %1028 = vmatprep.subr.bf16.mxu1 %v1326_v0 }
 0x178   : > { %1030 = vmatpush3.bf16.msra.mxu1 %v1017_v23 }
 0x179   : > { %1037 = vmatprep.subr.bf16.mxu1 %v1326_v0 }
 0x17a   : > { %v517_v37 = vpop.f32.mrb[2].mxu0 }
 0x17b   : > { %v973_v38 = vpop.f32.mrb[3].mxu0  ;;  %983 = vmatmul.mubr.msk.f32.vlgmr.msra.gmra.mrb[2].mxu1 %vm300_vm1, %v517_v37 }
 0x17c   : > { %1039 = vmatpush3.bf16.msra.mxu1 %v1014_v19  ;;  %1004 = vmatprep.mubr.msk.f32.mxu1 %vm1327_vm0, %v1328_v1 }
 0x17d   : > { %1040 = vmatprep.subr.bf16.mxu1 %v1326_v0 }
 0x180   : > { %1042 = vmatpush3.bf16.msra.mxu1 %v1017_v23 }
 0x182   : > { %v664_v39 = vpop.f32.mrb[4].mxu0 }
 0x183   : > { %v995_v40 = vpop.f32.mrb[5].mxu0  ;;  %1005 = vmatmul.mubr.msk.f32.vlgmr.msra.gmra.mrb[4].mxu1 %vm300_vm1, %v664_v39 }
 0x246   : > { %v443_v41 = vpop.f32.mrb[0].mxu1 }
 0x247   : > { %v962_v42 = vpop.f32.mrb[1].mxu1 }
 0x24e   : > { %v590_v43 = vpop.f32.mrb[2].mxu1 }
 0x24f   : > { %v741_v44 = vmax.f32 %v590_v43, 1e-24  ;;  %v984_v45 = vpop.f32.mrb[3].mxu1 }
 0x251   : > { %1120 = vrsqrt.f32 %v741_v44 }
 0x256   : > { %v737_v46 = vpop.f32.mrb[4].mxu1 }
 0x257   : > { %v744_v47 = vmax.f32 %v737_v46, 1e-24  ;;  %v1006_v48 = vpop.f32.mrb[5].mxu1 }
 0x259   : > { %1122 = vrsqrt.f32 %v744_v47 }
 0x25b   : > { %v1121_v50 = vpop.eup %1120 }
 0x25c   : > { %v743_v51 = vmul.f32 %v1121_v50, %v443_v41 }
 0x263   : > { %v1123_v54 = vpop.eup %1122 }
 0x264   : > { %v746_v55 = vmul.f32 %v1123_v54, %v743_v51 }
 0x266   : > { %v754_v56 = vsel %vm753_vm4, %v746_v55, 0.0 }
 0x267   : > { %755 = vst [vmem:[%s282_s14] sm:$0xff] %v754_v56 }
 0x268   : > { %1253 = shalt.err (!%p1250_p5)
}
 0x269   : > { %s1254_s0 = scalar_lea.hbm %s1631_s10, 128  ;;  %s1258_s5 = scalar_lea.hbm %s1679_s4, 256 }
 0x26a   : > { %p1255_p1 = scmp.ne.s32.totalorder %s1631_s10, %s1254_s0  ;;  %p1259_p10 = scmp.lt.u32.totalorder %s1631_s10, %s1679_s4 }
 0x26b   : > { %p1260_p2 = scmp.lt.u32.totalorder %s1258_s5, %s1254_s0  ;;  %p1262_p7 = scmp.lt.u32.totalorder %s1254_s0, %s1631_s10 }
 0x26c   : > { %p1256_p8 = pnand %p1255_p1, %p1704_p6 }
 0x26d   : > { %p1261_p0 = por %p1260_p2, %p1259_p10 }
 0x26e   : > { %p1257_p9 = pneg %p1256_p8 }
 0x26f   : > { %p1263_p12 = por %p1262_p7, %p1261_p0 }
 0x271   : > { %p1264_p13 = pnand %p1263_p12, %p1257_p9 }
 0x273   : > { %1267 = shalt.err (!%p1264_p13)
}
 0x274   : > { %1055 = dma.vmem_to_hbm [thread:$0]  (%p1704_p6), %s1633_s6, 128, %s1631_s10, %s757_s11  }
 0x275 PF: > { %s782_s29 = sand.u32 1, %s1306_s15   ;;  %p1705_p11 = scmp.ne.s32.totalorder %s1690_s28, 0 }
 0x276   : > { %p1706_p3 = scmp.ge.s32.totalorder %s1318_s18, 2  ;;  %s783_s26 = scalar_lea.sflag [#allocation4], %s782_s29 }
 0x278   : > { %p1072_p4 = pnand %p1706_p3, %p1705_p11 }
 0x27a   : > { %1301 = dma.done.wait (!%p1072_p4), %s783_s26, 128  }
 0x27b   : > { %1303 = vsyncadd (!%p1072_p4), %s783_s26, 4294967168  ;;  %p21_p5 = scmp.ge.s32.totalorder %s1380_s21, 4   ;;  %s1707_s15 = smov %s1310_s16 }
 0x27c   : > { %s1708_s16 = smov %s1314_s17  ;;  %s1709_s17 = smov %s1392_s24 }
 0x27d   : > { %s1710_s18 = smov %s1380_s21  ;;  %23 = sbr.rel (!%p21_p5) target bundleno = 10 (0xa), region = 102 }
 0x284   :  { %788 = vsyncpa [#allocation3], 1 }
 0x285   :  { %790 = vsyncpa [#allocation3 + $0x1], 1 }
 0x286   :  { %791 = vsyncpa [#allocation6], 1 }
 0x287   :  { %793 = vsyncpa [#allocation6 + $0x1], 1 }
 0x288   :  { %794 = vsyncpa [#allocation9], 1 }
 0x289   :  { %795 = vsyncpa [#allocation4], 1 }
 0x28a   :  { %797 = vsyncpa [#allocation4 + $0x1], 1 }

</bundles_post_ra>
